<compile_context>
chip_gen: v6e
topology: v6e:2x2x1
jax: 0.10.0
libtpu: 0.0.40
codegen_flags: <defaults>
</compile_context>

<pallas_src>
import functools

import jax
import jax.numpy as jnp
from jax.experimental import pallas as pl
from jax.experimental.pallas import tpu as pltpu


# -----------------------------------------------------------------------------
# Fused kernel: Conv2d (no bias) -> InstanceNorm2d (affine=False) -> activation
# -----------------------------------------------------------------------------
def _conv_norm_act_kernel(x_ref, w_ref, mask_ref, o_ref, *,
                          kh, kw, dil, wp, n_wide, n_valid, eps, norm, act):
    """One batch element per grid step.

    x_ref:    (1, Cin, Hp*Wp + (kw-1)*dil)  flattened, padded NCHW image
    w_ref:    (Cout, kh*kw*Cin)             folded filter (resident across steps)
    mask_ref: (1, n_wide)                   1.0 on valid flat-window columns
    o_ref:    (1, Cout, n_wide)             "wide" NCHW output (Ho x Wp columns)
    """
    cout = o_ref.shape[1]

    # im2col via the shifted flat-window trick: every tap is a *contiguous* slice
    # of the flattened image (no per-tap reshape/relayout), concatenated along the
    # contraction (sublane) dimension.
    taps = []
    for i in range(kh):                       # static kh*kw tap loop
        for j in range(kw):
            off = i * dil * wp + j * dil
            taps.append(x_ref[0, :, off:off + n_wide])        # (Cin, n_wide)
    patch = jnp.concatenate(taps, axis=0)                      # (kh*kw*Cin, n_wide)

    # Single MXU contraction, K = kh*kw*Cin, f32 accumulation.
    acc = jnp.dot(w_ref[...], patch, preferred_element_type=jnp.float32)

    if norm == "instance":
        # InstanceNorm2d(affine=False): per-channel stats over the valid spatial
        # positions, single pass (sum and sum-of-squares); wrap-around columns of
        # the wide output are masked out of the statistics.
        m = mask_ref[...]                                      # (1, n_wide)
        am = acc * m
        s1 = jnp.sum(am, axis=1, keepdims=True)                # (Cout, 1)
        s2 = jnp.sum(am * acc, axis=1, keepdims=True)
        mu = s1 * (1.0 / n_valid)
        var = s2 * (1.0 / n_valid) - mu * mu
        acc = (acc - mu) * jax.lax.rsqrt(var + eps)

    if act == "relu":
        acc = jnp.maximum(acc, 0.0)
    elif act == "relu6":
        acc = jnp.clip(acc, 0.0, 6.0)
    elif act == "gelu":
        acc = jax.nn.gelu(acc, approximate=False)   # nn.GELU default = exact erf
    elif act == "silu":
        acc = acc * jax.nn.sigmoid(acc)

    o_ref[...] = acc.astype(o_ref.dtype).reshape(1, cout, n_wide)


# -----------------------------------------------------------------------------
# Wrapper (PyTorch layout in/out: NCHW activations, OIHW weights)
# -----------------------------------------------------------------------------
def conv_norm_act(x_nchw, weight_oihw, *, stride=1, padding=0, dilation=1,
                  groups=1, norm="instance", act="relu", eps=1e-5,
                  compute_dtype=jnp.bfloat16):
    assert stride == 1 and groups == 1, "TODO(synk): stride>1 / groups>1"
    assert norm in ("instance", None, False), "TODO(synk): BatchNorm2d needs cross-batch stats"
    B, Cin, H, W = x_nchw.shape
    Cout, Cin_w, kh, kw = weight_oihw.shape
    assert Cin_w == Cin

    p = padding
    x = x_nchw
    if p:
        x = jnp.pad(x, ((0, 0), (0, 0), (p, p), (p, p)))
    Hp, Wp = H + 2 * p, W + 2 * p
    Ho = Hp - dilation * (kh - 1)
    Wo = Wp - dilation * (kw - 1)
    assert Ho > 0 and Wo > 0

    # Flattened NCHW image with a (kw-1)*dil zero tail so every tap's flat window
    # stays in bounds; cast ONCE to the MXU operand dtype (halves input DMA too).
    tail = (kw - 1) * dilation
    x_flat = x.reshape(B, Cin, Hp * Wp)
    if tail:
        x_flat = jnp.pad(x_flat, ((0, 0), (0, 0), (0, tail)))
    x_flat = x_flat.astype(compute_dtype)
    flat_len = Hp * Wp + tail

    # Folded 2-D filter (Cout, kh*kw*Cin), rows ordered (i, j, cin) to match the
    # in-kernel tap concatenation; cast once here (no per-grid-step cast).
    K = kh * kw * Cin
    w2d = jnp.transpose(weight_oihw, (0, 2, 3, 1)).reshape(Cout, K).astype(compute_dtype)

    # Validity mask for the "wide" (Ho x Wp) output: columns whose in-row position
    # is >= Wo are flat-window wrap-around garbage, excluded from the norm stats.
    n_wide = Ho * Wp
    col = jnp.arange(n_wide, dtype=jnp.int32) % Wp
    mask = (col < Wo).astype(jnp.float32).reshape(1, n_wide)

    kernel = functools.partial(
        _conv_norm_act_kernel, kh=kh, kw=kw, dil=dilation, wp=Wp,
        n_wide=n_wide, n_valid=float(Ho * Wo), eps=eps, norm=norm, act=act)

    out_wide = pl.pallas_call(
        kernel,
        out_shape=jax.ShapeDtypeStruct((B, Cout, n_wide), x_nchw.dtype),
        grid=(B,),
        in_specs=[
            pl.BlockSpec((1, Cin, flat_len), lambda b: (b, 0, 0)),
            pl.BlockSpec((Cout, K), lambda b: (0, 0)),       # resident weight
            pl.BlockSpec((1, n_wide), lambda b: (0, 0)),     # resident mask
        ],
        out_specs=pl.BlockSpec((1, Cout, n_wide), lambda b: (b, 0, 0)),
        compiler_params=pltpu.CompilerParams(
            dimension_semantics=("parallel",),   # batch axis -> both TCs on v7x
        ),
    )(x_flat, w2d, mask)

    # Free reshape + width slice (drops wrap-around columns).  No transpose: the
    # kernel already produced channel-major (NCHW) data.
    return out_wide.reshape(B, Cout, Ho, Wp)[:, :, :, :Wo]


# -----------------------------------------------------------------------------
# Pure-JAX reference (correctness check)
# -----------------------------------------------------------------------------
def ref_conv_norm_act(x_nchw, weight_oihw, *, padding=0, dilation=1, eps=1e-5):
    y = jax.lax.conv_general_dilated(
        x_nchw.astype(jnp.float32), weight_oihw.astype(jnp.float32),
        window_strides=(1, 1), padding=[(padding, padding), (padding, padding)],
        rhs_dilation=(dilation, dilation),
        dimension_numbers=('NCHW', 'OIHW', 'NCHW'))
    mu = jnp.mean(y, axis=(2, 3), keepdims=True)
    var = jnp.mean((y - mu) ** 2, axis=(2, 3), keepdims=True)
    y = (y - mu) / jnp.sqrt(var + eps)
    return jnp.maximum(y, 0.0)


# -----------------------------------------------------------------------------
if __name__ == "__main__":
    key = jax.random.PRNGKey(0)
    kx, kw_ = jax.random.split(key)

    # Small shapes consistent with the module defaults (kernel 3, pad 0, no bias).
    B, Cin, H, W, Cout = 2, 16, 16, 16, 32
    x = jax.random.normal(kx, (B, Cin, H, W), jnp.float32)
    weight = jax.random.normal(kw_, (Cout, Cin, 3, 3), jnp.float32) * 0.1

    ref = jax.block_until_ready(ref_conv_norm_act(x, weight))

    # f32 MXU path: tight correctness check against the reference.
    out_f32 = jax.block_until_ready(
        conv_norm_act(x, weight, compute_dtype=jnp.float32))
    assert out_f32.shape == (B, Cout, H - 2, W - 2), out_f32.shape
    err_f32 = float(jnp.max(jnp.abs(out_f32 - ref)))
    assert err_f32 < 1e-3 * (1.0 + float(jnp.max(jnp.abs(ref)))), \
        f"f32 path mismatch vs reference: max abs err {err_f32}"

    # Default bf16-operand path: looser tolerance (bf16 MXU operands, f32 accum).
    out_bf16 = jax.block_until_ready(conv_norm_act(x, weight))
    assert out_bf16.shape == (B, Cout, H - 2, W - 2), out_bf16.shape
    err_bf16 = float(jnp.max(jnp.abs(out_bf16 - ref)))
    assert err_bf16 < 2e-2 * (1.0 + float(jnp.max(jnp.abs(ref)))), \
        f"bf16 path mismatch vs reference: max abs err {err_bf16}"

    print("KERNEL_OK")
</pallas_src>

<mosaic_0001>
module attributes {stable_mosaic.version = 11 : i64} {
  func.func @_conv_norm_act_kernel(%arg0: i32, %arg1: memref<1x16x258xf32, #tpu.memory_space<vmem>>, %arg2: memref<32x144xf32, #tpu.memory_space<vmem>>, %arg3: memref<1x224xf32, #tpu.memory_space<vmem>>, %arg4: memref<1x32x224xf32, #tpu.memory_space<vmem>>) attributes {dimension_semantics = [#tpu.dimension_semantics<parallel>], iteration_bounds = array<i64: 2>, scalar_prefetch = 0 : i64, scratch_operands = 0 : i64, tpu.core_type = #tpu.core_type<tc>, window_params = [{transform_indices = @transform_0, window_bounds = array<i64: 1, 16, 258>}, {pipeline_mode = #tpu.pipeline_mode<synchronous>, transform_indices = @transform_1, window_bounds = array<i64: 32, 144>}, {pipeline_mode = #tpu.pipeline_mode<synchronous>, transform_indices = @transform_2, window_bounds = array<i64: 1, 224>}, {transform_indices = @transform_3, window_bounds = array<i64: 1, 32, 224>}]} {
    %c0 = arith.constant 0 : index
    %c0_0 = arith.constant 0 : index
    %c0_1 = arith.constant 0 : index
    %0 = vector.load %arg1[%c0, %c0_0, %c0_1] : memref<1x16x258xf32, #tpu.memory_space<vmem>>, vector<1x16x224xf32>
    %1 = vector.shape_cast %0 : vector<1x16x224xf32> to vector<16x224xf32>
    %c0_2 = arith.constant 0 : index
    %c0_3 = arith.constant 0 : index
    %c1 = arith.constant 1 : index
    %2 = vector.load %arg1[%c0_2, %c0_3, %c1] : memref<1x16x258xf32, #tpu.memory_space<vmem>>, vector<1x16x224xf32>
    %3 = vector.shape_cast %2 : vector<1x16x224xf32> to vector<16x224xf32>
    %c0_4 = arith.constant 0 : index
    %c0_5 = arith.constant 0 : index
    %c2 = arith.constant 2 : index
    %4 = vector.load %arg1[%c0_4, %c0_5, %c2] : memref<1x16x258xf32, #tpu.memory_space<vmem>>, vector<1x16x224xf32>
    %5 = vector.shape_cast %4 : vector<1x16x224xf32> to vector<16x224xf32>
    %c0_6 = arith.constant 0 : index
    %c0_7 = arith.constant 0 : index
    %c16 = arith.constant 16 : index
    %6 = vector.load %arg1[%c0_6, %c0_7, %c16] : memref<1x16x258xf32, #tpu.memory_space<vmem>>, vector<1x16x224xf32>
    %7 = vector.shape_cast %6 : vector<1x16x224xf32> to vector<16x224xf32>
    %c0_8 = arith.constant 0 : index
    %c0_9 = arith.constant 0 : index
    %c17 = arith.constant 17 : index
    %8 = vector.load %arg1[%c0_8, %c0_9, %c17] : memref<1x16x258xf32, #tpu.memory_space<vmem>>, vector<1x16x224xf32>
    %9 = vector.shape_cast %8 : vector<1x16x224xf32> to vector<16x224xf32>
    %c0_10 = arith.constant 0 : index
    %c0_11 = arith.constant 0 : index
    %c18 = arith.constant 18 : index
    %10 = vector.load %arg1[%c0_10, %c0_11, %c18] : memref<1x16x258xf32, #tpu.memory_space<vmem>>, vector<1x16x224xf32>
    %11 = vector.shape_cast %10 : vector<1x16x224xf32> to vector<16x224xf32>
    %c0_12 = arith.constant 0 : index
    %c0_13 = arith.constant 0 : index
    %c32 = arith.constant 32 : index
    %12 = vector.load %arg1[%c0_12, %c0_13, %c32] : memref<1x16x258xf32, #tpu.memory_space<vmem>>, vector<1x16x224xf32>
    %13 = vector.shape_cast %12 : vector<1x16x224xf32> to vector<16x224xf32>
    %c0_14 = arith.constant 0 : index
    %c0_15 = arith.constant 0 : index
    %c33 = arith.constant 33 : index
    %14 = vector.load %arg1[%c0_14, %c0_15, %c33] : memref<1x16x258xf32, #tpu.memory_space<vmem>>, vector<1x16x224xf32>
    %15 = vector.shape_cast %14 : vector<1x16x224xf32> to vector<16x224xf32>
    %c0_16 = arith.constant 0 : index
    %c0_17 = arith.constant 0 : index
    %c34 = arith.constant 34 : index
    %16 = vector.load %arg1[%c0_16, %c0_17, %c34] : memref<1x16x258xf32, #tpu.memory_space<vmem>>, vector<1x16x224xf32>
    %17 = vector.shape_cast %16 : vector<1x16x224xf32> to vector<16x224xf32>
    %18 = tpu.concatenate %1, %3, %5, %7, %9, %11, %13, %15, %17 in 0 : vector<16x224xf32>, vector<16x224xf32>, vector<16x224xf32>, vector<16x224xf32>, vector<16x224xf32>, vector<16x224xf32>, vector<16x224xf32>, vector<16x224xf32>, vector<16x224xf32> -> vector<144x224xf32>
    %c0_18 = arith.constant 0 : index
    %c0_19 = arith.constant 0 : index
    %19 = vector.load %arg2[%c0_18, %c0_19] : memref<32x144xf32, #tpu.memory_space<vmem>>, vector<32x144xf32>
    %cst = arith.constant dense<0.000000e+00> : vector<32x224xf32>
    %20 = tpu.matmul %19, %18, %cst {dimension_numbers = #tpu.dot_dimension_numbers<[1], [0], [0], [1], [0, 0, 1, 1], [], []>} : vector<32x144xf32>, vector<144x224xf32>, vector<32x224xf32> -> vector<32x224xf32>
    %c0_20 = arith.constant 0 : index
    %c0_21 = arith.constant 0 : index
    %21 = vector.load %arg3[%c0_20, %c0_21] : memref<1x224xf32, #tpu.memory_space<vmem>>, vector<1x224xf32>
    %22 = vector.broadcast %21 : vector<1x224xf32> to vector<32x224xf32>
    %23 = arith.mulf %20, %22 : vector<32x224xf32>
    %cst_22 = arith.constant dense<0.000000e+00> : vector<32xf32>
    %24 = vector.multi_reduction <add>, %23, %cst_22 [1] : vector<32x224xf32> to vector<32xf32>
    %25 = vector.shape_cast %24 : vector<32xf32> to vector<32x1xf32>
    %26 = arith.mulf %23, %20 : vector<32x224xf32>
    %cst_23 = arith.constant dense<0.000000e+00> : vector<32xf32>
    %27 = vector.multi_reduction <add>, %26, %cst_23 [1] : vector<32x224xf32> to vector<32xf32>
    %28 = vector.shape_cast %27 : vector<32xf32> to vector<32x1xf32>
    %cst_24 = arith.constant 0.00510204071 : f32
    %29 = vector.broadcast %cst_24 : f32 to vector<32x1xf32>
    %30 = arith.mulf %25, %29 : vector<32x1xf32>
    %cst_25 = arith.constant 0.00510204071 : f32
    %31 = vector.broadcast %cst_25 : f32 to vector<32x1xf32>
    %32 = arith.mulf %28, %31 : vector<32x1xf32>
    %33 = arith.mulf %30, %30 : vector<32x1xf32>
    %34 = arith.subf %32, %33 : vector<32x1xf32>
    %35 = vector.broadcast %30 : vector<32x1xf32> to vector<32x224xf32>
    %36 = arith.subf %20, %35 : vector<32x224xf32>
    %cst_26 = arith.constant 9.99999974E-6 : f32
    %37 = vector.broadcast %cst_26 : f32 to vector<32x1xf32>
    %38 = arith.addf %34, %37 : vector<32x1xf32>
    %39 = math.rsqrt %38 : vector<32x1xf32>
    %40 = vector.broadcast %39 : vector<32x1xf32> to vector<32x224xf32>
    %41 = arith.mulf %36, %40 : vector<32x224xf32>
    %cst_27 = arith.constant 0.000000e+00 : f32
    %42 = vector.broadcast %cst_27 : f32 to vector<32x224xf32>
    %43 = arith.maximumf %41, %42 : vector<32x224xf32>
    %44 = vector.shape_cast %43 : vector<32x224xf32> to vector<1x32x224xf32>
    %c0_28 = arith.constant 0 : index
    %c0_29 = arith.constant 0 : index
    %c0_30 = arith.constant 0 : index
    %45 = vector.load %arg4[%c0_28, %c0_29, %c0_30] : memref<1x32x224xf32, #tpu.memory_space<vmem>>, vector<1x32x224xf32>
    tpu.vector_store %arg4[%c0_28, %c0_29, %c0_30], %44 {strides = array<i32>} : memref<1x32x224xf32, #tpu.memory_space<vmem>>, vector<1x32x224xf32>,
    return
  }
  func.func @transform_0(%arg0: i32) -> (i32, i32, i32) {
    %c0_i32 = arith.constant 0 : i32
    %c0_i32_0 = arith.constant 0 : i32
    %c0_i32_1 = arith.constant 0 : i32
    return %arg0, %c0_i32, %c0_i32_0 : i32, i32, i32
  }
  func.func @transform_1(%arg0: i32) -> (i32, i32) {
    %c0_i32 = arith.constant 0 : i32
    %c0_i32_0 = arith.constant 0 : i32
    %c0_i32_1 = arith.constant 0 : i32
    return %c0_i32, %c0_i32_0 : i32, i32
  }
  func.func @transform_2(%arg0: i32) -> (i32, i32) {
    %c0_i32 = arith.constant 0 : i32
    %c0_i32_0 = arith.constant 0 : i32
    %c0_i32_1 = arith.constant 0 : i32
    return %c0_i32, %c0_i32_0 : i32, i32
  }
  func.func @transform_3(%arg0: i32) -> (i32, i32, i32) {
    %c0_i32 = arith.constant 0 : i32
    %c0_i32_0 = arith.constant 0 : i32
    %c0_i32_1 = arith.constant 0 : i32
    return %arg0, %c0_i32, %c0_i32_0 : i32, i32, i32
  }
}

</mosaic_0001>

<bundles_post_ra>
// kernel: tpu_custom_call.1
= control target key start
LH: loop header
LB: loop body
LE: loop exit
PB: predicated region body
PF: predicated region fallthrough
CT: control target
= control target key end

     0   :  { %8 = vsyncpa [#allocation3], 0  ;;  %s1270_s0 = inlined_call_operand.hbm [shape: f32[2,16,258], index: 0, kind: input, shape index: {}]   ;;  %s1271_s1 = inlined_call_operand.hbm [shape: f32[32,144], index: 1, kind: input, shape index: {}]   ;;  %s1272_s2 = inlined_call_operand.vmem [shape: f32[1,224], index: 2, kind: input, shape index: {}]   ;;  %s1273_s3 = inlined_call_operand.hbm [shape: f32[2,32,224], index: 3, kind: output, shape index: {}]  }
   0x1   :  { %10 = vsyncpa [#allocation3 + $0x1], 0 }
   0x2   :  { %11 = vsyncpa [#allocation6], 0 }
   0x3   :  { %12 = vsyncpa [#allocation4], 0 }
   0x4   :  { %14 = vsyncpa [#allocation4 + $0x1], 0  ;;  %s968_s12 = smov 0   ;;  %s970_s13 = smov 0  }
   0x5   :  { %s972_s14 = smov 0   ;;  %s974_s15 = smov 0  }
   0x6 LB: > { %s989_s16 = sadd.s32 4294967295, %s929_s15   ;;  %s671_s17 = sadd.s32 4294967294, %s929_s15   ;;  %s929_s15 = sphi %s974_s15, %s1295_s15   ;;  %s925_s14 = sphi %s972_s14, %s1294_s14   ;;  %s921_s13 = sphi %s970_s13, %s1293_s13   ;;  %s917_s12 = sphi %s968_s12, %s1292_s12  }
   0x7   : > { %p40_p0 = scmp.ne.s32.totalorder %s921_s13, %s917_s12  ;;  %p1274_p1 = scmp.eq.s32.totalorder %s989_s16, 0 }
   0x8   : > { %p112_p3 = scmp.eq.s32.totalorder %s671_s17, 1  ;;  %p672_p5 = scmp.ge.s32.totalorder %s929_s15, 1 }
   0x9   : > { %p998_p4 = por %p1274_p1, %p40_p0  ;;  %p119_p7 = scmp.lt.s32.totalorder %s929_s15, 3 }
   0xa   : > { %p1003_p6 = por %p112_p3, %p40_p0  ;;  %s931_s21 = smov [#allocation5]  }
   0xb   : > { %s1278_s18 = scalar_select %p998_p4, 1, 0 }
   0xc   : > { %s1279_s19 = scalar_select %p1003_p6, 1, 0 }
   0xd   : > { %p1008_p8 = pnand %p672_p5, %p119_p7  ;;  %s131_s22 = sshll.u32 %s931_s21, 4  ;;  %s132_s22 = int_to_ptr.vmem [resolvable:$true] %s131_s22 }
   0xe   : > { %s1022_s24 = sadd.s32 1, %s929_s15   ;;  %s27_s25 = sadd.s32 1, %s925_s14 }
   0xf   : > { %s1280_s20 = scalar_select %p1008_p8, 1, 0 }
  0x10   : > { %p736_p9 = pneg %p1008_p8  ;;  %s24_s26 = ssub.s32 %s929_s15, %s1022_s24 }
  0x11   : > { %s818_s27 = scalar_lea.vmem %s132_s22, 1024  ;;  %p826_p5 = scmp.lt.s32.totalorder %s132_s22, %s132_s22 }
  0x12   : > { %p1017_p11 = pnand %p736_p9, %p1274_p1  ;;  %p819_p13 = scmp.ne.s32.totalorder %s132_s22, %s818_s27 }
  0x13   : > { %p827_p7 = scmp.lt.s32.totalorder %s818_s27, %s818_s27 }
  0x14   : > { %p809_p12 = pneg %p1017_p11 }
  0x15   : > { %p828_p10 = por %p827_p7, %p826_p5 }
  0x16   : > { %p821_p0 = pnand %p819_p13, %p809_p12 }
  0x18   : > { %p822_p3 = pneg %p821_p0 }
  0x1a   : > { %p829_p2 = pnand %p828_p10, %p822_p3 }
  0x1c   : > { %832 = shalt.err (!%p829_p2)
}
  0x1d   : > { %s932_s28 = smov 256   ;;  %s933_s29 = smov 16  }
  0x1e   : > { %739 = dma.hbm_to_vmem [thread:$0]  (!%p1017_p11), %s1271_s1, 1024, %s132_s22, [#allocation6], %s932_s28, %s932_s28, %s933_s29  }
  0x1f   : > { %p25_p9 = scmp.eq.s32.totalorder %s24_s26, 0  ;;  %p34_p12 = scmp.ne.s32.totalorder %s925_s14, %s921_s13 }
  0x20   : > { %p35_p10 = scmp.eq.s32.totalorder %s929_s15, 0  ;;  %p749_p2 = scmp.lt.s32.totalorder %s929_s15, 2 }
  0x21   : > { %s1039_s5 = scalar_select %p25_p9, %s925_s14, %s27_s25  }
  0x22   : > { %p36_p13 = por %p35_p10, %p34_p12  ;;  %p1282_p0 = scmp.eq.s32.totalorder %s989_s16, 1 }
  0x23   : > { %s148_s7 = sand.u32 1, %s925_s14   ;;  %s726_s8 = smul.u32 768, %s929_s15 }
  0x24   : > { %p1043_p3 = por %p1282_p0, %p34_p12  ;;  %s725_s9 = smul.u32 48, %s148_s7 }
  0x25   : > { %s1052_s17 = scalar_lea.hbm %s1270_s0, %s726_s8  ;;  %p1054_p11 = pnand %p749_p2, %p36_p13 }
  0x26   : > { %s1283_s6 = scalar_select %p1043_p3, 1, 0 }
  0x27   : > { %s152_s22 = scalar_lea.vmem [#allocation2], %s725_s9  ;;  %s1060_s25 = scalar_lea.sflag [#allocation3], %s148_s7 }
  0x28   : > { %s159_s23 = sshll.u32 %s152_s22, 4  ;;  %s833_s26 = scalar_lea.hbm %s1052_s17, 768  ;;  %s1058_s23 = int_to_ptr.vmem [resolvable:$true] %s159_s23 }
  0x29   : > { %p834_p5 = scmp.ne.s32.totalorder %s1052_s17, %s833_s26  ;;  %p835_p7 = pneg %p1054_p11 }
  0x2a   : > { %s838_s29 = scalar_lea.hbm %s1270_s0, 1536  ;;  %p839_p10 = scmp.lt.s32.totalorder %s1052_s17, %s1270_s0 }
  0x2b   : > { %p836_p9 = pnand %p835_p7, %p834_p5  ;;  %p840_p2 = scmp.lt.s32.totalorder %s838_s29, %s833_s26 }
  0x2d   : > { %p837_p12 = pneg %p836_p9  ;;  %p841_p13 = por %p840_p2, %p839_p10 }
  0x2f   : > { %p842_p0 = pnand %p841_p13, %p837_p12 }
  0x31   : > { %845 = shalt.err (!%p842_p0)
}
  0x32   : > { %s846_s7 = scalar_lea.vmem %s1058_s23, 768  ;;  %s934_s8 = smov [#allocation2]  }
  0x33   : > { %p847_p1 = scmp.ne.s32.totalorder %s1058_s23, %s846_s7  ;;  %s851_s9 = sshll.u32 %s934_s8, 4  ;;  %s852_s9 = int_to_ptr.vmem [resolvable:$false] %s851_s9 }
  0x34   : > { %s853_s10 = scalar_lea.vmem %s852_s9, 1536  ;;  %p854_p9 = scmp.lt.s32.totalorder %s1058_s23, %s852_s9 }
  0x35   : > { %p849_p6 = pnand %p847_p1, %p835_p7  ;;  %p855_p3 = scmp.lt.s32.totalorder %s853_s10, %s846_s7 }
  0x37   : > { %p850_p5 = pneg %p849_p6  ;;  %p856_p4 = por %p855_p3, %p854_p9 }
  0x39   : > { %p857_p8 = pnand %p856_p4, %p850_p5 }
  0x3b   : > { %860 = shalt.err (!%p857_p8)
}
  0x3c   : > { %s935_s11 = smov 384   ;;  %s936_s22 = smov 24  }
  0x3d   : > { %743 = dma.hbm_to_vmem [thread:$0]  (!%p1054_p11), %s1052_s17, 768, %s1058_s23, %s1060_s25, %s935_s11, %s935_s11, %s936_s22  }
  0x3e   : > { %p1285_p1 = scmp.ne.s32.totalorder %s1280_s20, 0 }
  0x3f   : > { %s1084_s26 = sand.u32 (!%p1285_p1), 1, %s921_s13   ;;  %p1286_p4 = scmp.ne.s32.totalorder (!%p1285_p1), %s1278_s18, 0 }
  0x40   : > { %171 = sbr.rel (%p1285_p1) target bundleno = 652 (0x28c), region = 32  ;;  %s174_s28 = scalar_lea.sflag (!%p1285_p1), [#allocation3], %s1084_s26 }
  0x41   : > { %s727_s27 = smul.u32 (!%p1285_p1), 48, %s1084_s26 }
  0x43   : > { %s177_s29 = scalar_lea.vmem (!%p1285_p1), [#allocation2], %s727_s27 }
  0x45   : > { %904 = dma.done.wait (%p1286_p4), %s174_s28, 768  }
  0x46   : > { %906 = vsyncadd (%p1286_p4), %s174_s28, 4294966528  ;;  %p1287_p6 = scmp.eq.s32.totalorder %s989_s16, 0 }
  0x48   : > { %908 = dma.done.wait (%p1287_p6), [#allocation6], 1024   ;;  %p1288_p8 = pmov %p1287_p6 }
  0x49   : > { %v1096_v0 = vld [vmem:[%s177_s29 + $0x20] sm:$0xff]  ;;  %v1098_v1 = vld [vmem:[%s177_s29 + $0x18] sm:$0xff]  ;;  %s937_s20 = smov 95   ;;  %v209_v2 = vld [vmem:[%s177_s29 + $0x28] sm:$0xff]  ;;  %s938_s18 = smov 96   ;;  %vm356_vm0 = vcmask 130048  }
  0x4a   : > { %910 = vsyncadd (%p1288_p8), [#allocation6], 4294966272  ;;  %314 = vrot.lane.b32.xlu0 %v1096_v0, %s937_s20  ;;  %312 = vrot.lane.b32.xlu1 %v1098_v1, %s937_s20  ;;  %v1102_v3 = vld [vmem:[%s177_s29 + $0x8] sm:$0xff]  ;;  %v208_v4 = vld [vmem:[%s177_s29 + $0x10] sm:$0xff]  ;;  %s939_s17 = smov 110   ;;  %s940_s21 = smov 111  }
  0x4b   : > { %v1105_v5 = vld [vmem:[%s177_s29] sm:$0xff]  ;;  %s941_s23 = smov 112   ;;  %s942_s25 = smov 126   ;;  %v349_v6 = vld [vmem:[#allocation5 + $0x8] sm:$0xff]  ;;  %vm318_vm1 = vcmask 777216   ;;  %vm297_vm2 = vcmask 785408  }
  0x4c   : > { %s943_s30 = smov 127   ;;  %v353_v7 = vld [vmem:[#allocation5 + $0x28] sm:$0xff]  ;;  %679 = vmatprep.mubr.msk.f32.mxu0 %vm356_vm0, %v349_v6  ;;  %s944_s4 = smov 94   ;;  %vm282_vm3 = vcmask 900096   ;;  %vm267_vm4 = vcmask 908288   ;;  %vm252_vm5 = vcmask 916480   ;;  %v460_v6 = vlaneseq }
  0x4d   : > { %681 = vmatprep.mubr.msk.f32.mxu1 %vm356_vm0, %v353_v7  ;;  %vm237_vm6 = vcmask 1031168   ;;  %vm222_vm7 = vcmask 1039360   ;;  %vm339_vm8 = vcmask 769024   ;;  %s678_s9 = sshll.u32 %s1084_s26, 6  ;;  %s688_s11 = sshll.u32 %s989_s16, 10 }
  0x4e   : > { %316 = vrot.lane.b32.xlu0 %v209_v2, %s937_s20  ;;  %308 = vrot.lane.b32.xlu1 %v1102_v3, %s937_s20  ;;  %v461_v7 = vshrl.u32 %v460_v6, 7  ;;  %s1200_s10 = scalar_lea.vmem [#allocation7], %s678_s9  ;;  %s1222_s29 = scalar_lea.hbm %s1273_s3, %s688_s11 }
  0x4f   : > { %s588_s22 = sshll.u32 %s1200_s10, 4  ;;  %s575_s16 = scalar_lea.sflag [#allocation4], %s1084_s26  ;;  %s1224_s22 = int_to_ptr.vmem [resolvable:$true] %s588_s22 }
  0x50   : > { %p1289_p11 = scmp.ne.s32.totalorder %s1283_s6, 0 }
  0x52   : > { %310 = vrot.lane.b32.xlu0 %v208_v4, %s937_s20  ;;  %306 = vrot.lane.b32.xlu1 %v1105_v5, %s937_s20  ;;  %s861_s20 = scalar_lea.vmem %s1224_s22, 1024 }
  0x53   : > { %p862_p3 = scmp.ne.s32.totalorder %s1224_s22, %s861_s20 }
  0x55   : > { %p863_p7 = pnand %p862_p3, %p1289_p11 }
  0x56   : > { %293 = vrot.lane.b32.xlu0 %v1098_v1, %s938_s18  ;;  %295 = vrot.lane.b32.xlu1 %v1096_v0, %s938_s18 }
  0x57   : > { %p864_p12 = pneg %p863_p7 }
  0x5a   : > { %289 = vrot.lane.b32.xlu0 %v1105_v5, %s938_s18  ;;  %291 = vrot.lane.b32.xlu1 %v1102_v3, %s938_s18  ;;  %s945_s18 = smov [#allocation7]  }
  0x5e   : > { %278 = vrot.lane.b32.xlu0 %v1098_v1, %s939_s17  ;;  %280 = vrot.lane.b32.xlu1 %v1096_v0, %s939_s17 }
  0x62   : > { %274 = vrot.lane.b32.xlu0 %v1105_v5, %s939_s17  ;;  %276 = vrot.lane.b32.xlu1 %v1102_v3, %s939_s17  ;;  %s865_s17 = sshll.u32 %s945_s18, 4  ;;  %s866_s17 = int_to_ptr.vmem [resolvable:$false] %s865_s17 }
  0x63   : > { %p868_p10 = scmp.lt.s32.totalorder %s1224_s22, %s866_s17 }
  0x66   : > { %263 = vrot.lane.b32.xlu0 %v1098_v1, %s940_s21  ;;  %265 = vrot.lane.b32.xlu1 %v1096_v0, %s940_s21 }
  0x6a   : > { %259 = vrot.lane.b32.xlu0 %v1105_v5, %s940_s21  ;;  %261 = vrot.lane.b32.xlu1 %v1102_v3, %s940_s21  ;;  %s867_s21 = scalar_lea.vmem %s866_s17, 2048 }
  0x6b   : > { %p869_p2 = scmp.lt.s32.totalorder %s867_s21, %s861_s20 }
  0x6d   : > { %p870_p13 = por %p869_p2, %p868_p10 }
  0x6e   : > { %248 = vrot.lane.b32.xlu0 %v1098_v1, %s941_s23  ;;  %250 = vrot.lane.b32.xlu1 %v1096_v0, %s941_s23 }
  0x6f   : > { %p871_p0 = pnand %p870_p13, %p864_p12 }
  0x72   : > { %244 = vrot.lane.b32.xlu0 %v1105_v5, %s941_s23  ;;  %246 = vrot.lane.b32.xlu1 %v1102_v3, %s941_s23 }
  0x76   : > { %233 = vrot.lane.b32.xlu0 %v1098_v1, %s942_s25  ;;  %235 = vrot.lane.b32.xlu1 %v1096_v0, %s942_s25 }
  0x7a   : > { %229 = vrot.lane.b32.xlu0 %v1105_v5, %s942_s25  ;;  %231 = vrot.lane.b32.xlu1 %v1102_v3, %s942_s25 }
  0x7e   : > { %218 = vrot.lane.b32.xlu0 %v1098_v1, %s943_s30  ;;  %220 = vrot.lane.b32.xlu1 %v1096_v0, %s943_s30 }
  0x82   : > { %214 = vrot.lane.b32.xlu0 %v1105_v5, %s943_s30  ;;  %216 = vrot.lane.b32.xlu1 %v1102_v3, %s943_s30 }
  0x86   : > { %335 = vrot.lane.b32.xlu0 %v1096_v0, %s944_s4  ;;  %337 = vrot.lane.b32.xlu1 %v209_v2, %s944_s4  ;;  %v355_v2 = vld [vmem:[#allocation5 + $0x38] sm:$0xff] }
  0x8a   : > { %333 = vrot.lane.b32.xlu0 %v1098_v1, %s944_s4  ;;  %329 = vrot.lane.b32.xlu1 %v1102_v3, %s944_s4 }
  0x8e   : > { %331 = vrot.lane.b32.xlu0 %v208_v4, %s944_s4  ;;  %327 = vrot.lane.b32.xlu1 %v1105_v5, %s944_s4  ;;  %v354_v4 = vld [vmem:[#allocation5 + $0x30] sm:$0xff] }
  0xbc   : > { %v315_v8 = vpop.permute.xlu0 %314  ;;  %v313_v9 = vpop.permute.xlu1 %312 }
  0xbd   : > { %v321_v13 = vsel %vm318_vm1, %v313_v9, %v315_v8  ;;  %v458_v9 = vld [vmem:[%s1272_s2] sm:$0x3] }
  0xc0   : > { %v317_v10 = vpop.permute.xlu0 %316  ;;  %v309_v11 = vpop.permute.xlu1 %308 }
  0xc1   : > { %v322_v12 = vsel %vm318_vm1, %v315_v8, %v317_v10  ;;  %v462_v8 = vsub.s32 0, %v461_v7  ;;  %v466_v10 = vsub.s32 1, %v461_v7 }
  0xc2   : > { %369 = vmatprep.subr.mxu0 %v322_v12  ;;  %689 = vmatprep.subr.mxu1 %v322_v12 }
  0xc3   : > { %370 = vmatpush1.msra.mxu0 %v321_v13  ;;  %707 = vmatpush1.msra.mxu1 %v321_v13  ;;  %v467_v12 = vrot.slane %v458_v9, %v466_v10 }
  0xc4   : > { %v311_v14 = vpop.permute.xlu0 %310  ;;  %v307_v15 = vpop.permute.xlu1 %306 }
  0xc5   : > { %v320_v16 = vsel %vm318_vm1, %v309_v11, %v311_v14  ;;  %v319_v17 = vsel %vm318_vm1, %v307_v15, %v309_v11  ;;  %v463_v11 = vrot.slane %v458_v9, %v462_v8 }
  0xc6   : > { %371 = vmatprep.subr.mxu0 %v320_v16  ;;  %690 = vmatprep.subr.mxu1 %v320_v16 }
  0xc7   : > { %372 = vmatpush1.msra.mxu0 %v319_v17  ;;  %708 = vmatpush1.msra.mxu1 %v319_v17 }
  0xc8   : > { %v294_v18 = vpop.permute.xlu0 %293  ;;  %v296_v19 = vpop.permute.xlu1 %295 }
  0xc9   : > { %373 = vmatprep.subr.mxu0 %v296_v19  ;;  %691 = vmatprep.subr.mxu1 %v296_v19  ;;  %v299_v20 = vsel %vm297_vm2, %v294_v18, %v296_v19 }
  0xca   : > { %374 = vmatpush1.msra.mxu0 %v299_v20  ;;  %709 = vmatpush1.msra.mxu1 %v299_v20 }
  0xcc   : > { %v290_v21 = vpop.permute.xlu0 %289  ;;  %v292_v22 = vpop.permute.xlu1 %291 }
  0xcd   : > { %375 = vmatprep.subr.mxu0 %v292_v22  ;;  %692 = vmatprep.subr.mxu1 %v292_v22  ;;  %v298_v23 = vsel %vm297_vm2, %v290_v21, %v292_v22 }
  0xce   : > { %376 = vmatpush1.msra.mxu0 %v298_v23  ;;  %710 = vmatpush1.msra.mxu1 %v298_v23 }
  0xd0   : > { %v279_v24 = vpop.permute.xlu0 %278  ;;  %v281_v25 = vpop.permute.xlu1 %280 }
  0xd1   : > { %377 = vmatprep.subr.mxu0 %v281_v25  ;;  %693 = vmatprep.subr.mxu1 %v281_v25  ;;  %v284_v26 = vsel %vm282_vm3, %v279_v24, %v281_v25 }
  0xd2   : > { %378 = vmatpush1.msra.mxu0 %v284_v26  ;;  %711 = vmatpush1.msra.mxu1 %v284_v26 }
  0xd4   : > { %v275_v27 = vpop.permute.xlu0 %274  ;;  %v277_v28 = vpop.permute.xlu1 %276 }
  0xd5   : > { %379 = vmatprep.subr.mxu0 %v277_v28  ;;  %694 = vmatprep.subr.mxu1 %v277_v28  ;;  %v283_v29 = vsel %vm282_vm3, %v275_v27, %v277_v28 }
  0xd6   : > { %380 = vmatpush1.msra.mxu0 %v283_v29  ;;  %712 = vmatpush1.msra.mxu1 %v283_v29 }
  0xd8   : > { %v264_v30 = vpop.permute.xlu0 %263  ;;  %v266_v31 = vpop.permute.xlu1 %265 }
  0xd9   : > { %381 = vmatprep.subr.mxu0 %v266_v31  ;;  %695 = vmatprep.subr.mxu1 %v266_v31  ;;  %v269_v32 = vsel %vm267_vm4, %v264_v30, %v266_v31 }
  0xda   : > { %382 = vmatpush1.msra.mxu0 %v269_v32  ;;  %713 = vmatpush1.msra.mxu1 %v269_v32 }
  0xdc   : > { %v260_v33 = vpop.permute.xlu0 %259  ;;  %v262_v34 = vpop.permute.xlu1 %261 }
  0xdd   : > { %383 = vmatprep.subr.mxu0 %v262_v34  ;;  %696 = vmatprep.subr.mxu1 %v262_v34  ;;  %v268_v35 = vsel %vm267_vm4, %v260_v33, %v262_v34 }
  0xde   : > { %384 = vmatpush1.msra.mxu0 %v268_v35  ;;  %714 = vmatpush1.msra.mxu1 %v268_v35 }
  0xe0   : > { %v249_v36 = vpop.permute.xlu0 %248  ;;  %v251_v37 = vpop.permute.xlu1 %250 }
  0xe1   : > { %385 = vmatprep.subr.mxu0 %v251_v37  ;;  %697 = vmatprep.subr.mxu1 %v251_v37  ;;  %v254_v38 = vsel %vm252_vm5, %v249_v36, %v251_v37 }
  0xe2   : > { %386 = vmatpush1.msra.mxu0 %v254_v38  ;;  %715 = vmatpush1.msra.mxu1 %v254_v38 }
  0xe4   : > { %v245_v39 = vpop.permute.xlu0 %244  ;;  %v247_v40 = vpop.permute.xlu1 %246 }
  0xe5   : > { %387 = vmatprep.subr.mxu0 %v247_v40  ;;  %698 = vmatprep.subr.mxu1 %v247_v40  ;;  %v253_v41 = vsel %vm252_vm5, %v245_v39, %v247_v40 }
  0xe6   : > { %388 = vmatpush1.msra.mxu0 %v253_v41  ;;  %716 = vmatpush1.msra.mxu1 %v253_v41 }
  0xe8   : > { %v234_v42 = vpop.permute.xlu0 %233  ;;  %v236_v43 = vpop.permute.xlu1 %235 }
  0xe9   : > { %389 = vmatprep.subr.mxu0 %v236_v43  ;;  %699 = vmatprep.subr.mxu1 %v236_v43  ;;  %v239_v44 = vsel %vm237_vm6, %v234_v42, %v236_v43 }
  0xea   : > { %390 = vmatpush1.msra.mxu0 %v239_v44  ;;  %717 = vmatpush1.msra.mxu1 %v239_v44 }
  0xec   : > { %v230_v45 = vpop.permute.xlu0 %229  ;;  %v232_v46 = vpop.permute.xlu1 %231 }
  0xed   : > { %391 = vmatprep.subr.mxu0 %v232_v46  ;;  %700 = vmatprep.subr.mxu1 %v232_v46  ;;  %v238_v47 = vsel %vm237_vm6, %v230_v45, %v232_v46 }
  0xee   : > { %392 = vmatpush1.msra.mxu0 %v238_v47  ;;  %718 = vmatpush1.msra.mxu1 %v238_v47 }
  0xf0   : > { %v219_v48 = vpop.permute.xlu0 %218  ;;  %v221_v49 = vpop.permute.xlu1 %220 }
  0xf1   : > { %393 = vmatprep.subr.mxu0 %v221_v49  ;;  %701 = vmatprep.subr.mxu1 %v221_v49  ;;  %v224_v50 = vsel %vm222_vm7, %v219_v48, %v221_v49 }
  0xf2   : > { %394 = vmatpush1.msra.mxu0 %v224_v50  ;;  %719 = vmatpush1.msra.mxu1 %v224_v50 }
  0xf4   : > { %v215_v51 = vpop.permute.xlu0 %214  ;;  %v217_v52 = vpop.permute.xlu1 %216 }
  0xf5   : > { %395 = vmatprep.subr.mxu0 %v217_v52  ;;  %702 = vmatprep.subr.mxu1 %v217_v52  ;;  %v223_v53 = vsel %vm222_vm7, %v215_v51, %v217_v52 }
  0xf6   : > { %396 = vmatpush1.msra.mxu0 %v223_v53  ;;  %720 = vmatpush1.msra.mxu1 %v223_v53 }
  0xf7   : > { %397 = vmatprep.subr.mxu0 %v1096_v0  ;;  %703 = vmatprep.subr.mxu1 %v1096_v0  ;;  %v348_v0 = vld [vmem:[#allocation5] sm:$0xff] }
  0xf8   : > { %v336_v54 = vpop.permute.xlu0 %335  ;;  %398 = vmatpush1.msra.mxu0 %v1098_v1  ;;  %721 = vmatpush1.msra.mxu1 %v1098_v1  ;;  %v338_v55 = vpop.permute.xlu1 %337  ;;  %v352_v1 = vld [vmem:[#allocation5 + $0x20] sm:$0xff] }
  0xf9   : > { %399 = vmatprep.subr.mxu0 %v1102_v3  ;;  %704 = vmatprep.subr.mxu1 %v1102_v3  ;;  %v343_v56 = vsel %vm339_vm8, %v336_v54, %v338_v55  ;;  %v351_v3 = vld [vmem:[#allocation5 + $0x18] sm:$0xff] }
  0xfa   : > { %400 = vmatpush1.msra.mxu0 %v1105_v5  ;;  %722 = vmatpush1.msra.mxu1 %v1105_v5  ;;  %v350_v5 = vld [vmem:[#allocation5 + $0x10] sm:$0xff] }
  0xfb   : > { %429 = vmatprep.subr.mxu0 %v343_v56  ;;  %705 = vmatprep.subr.mxu1 %v343_v56 }
  0xfc   : > { %v334_v57 = vpop.permute.xlu0 %333  ;;  %v330_v58 = vpop.permute.xlu1 %329 }
  0xfd   : > { %v342_v59 = vsel %vm339_vm8, %v334_v57, %v336_v54 }
  0xfe   : > { %430 = vmatpush2.msra.mxu0 %v342_v59  ;;  %723 = vmatpush2.msra.mxu1 %v342_v59 }
 0x100   : > { %v332_v60 = vpop.permute.xlu0 %331  ;;  %v328_v61 = vpop.permute.xlu1 %327 }
 0x101   : > { %v341_v62 = vsel %vm339_vm8, %v330_v58, %v332_v60  ;;  %v340_v63 = vsel %vm339_vm8, %v328_v61, %v330_v58 }
 0x102   : > { %431 = vmatprep.subr.mxu0 %v341_v62  ;;  %706 = vmatprep.subr.mxu1 %v341_v62 }
 0x103   : > { %432 = vmatpush2.msra.mxu0 %v340_v63  ;;  %724 = vmatpush2.msra.mxu1 %v340_v63 }
 0x104   : > { %434 = vmatmul.mubr.f32.vlgmr.msra.gmra.mxu0 %v348_v0  ;;  %446 = vmatmul.mubr.f32.vlgmr.msra.gmra.mxu1 %v352_v1 }
 0x105   : > { %682 = vmatprep.mubr.msk.f32.mxu1 %vm356_vm0, %v355_v2  ;;  %680 = vmatprep.mubr.msk.f32.mxu0 %vm356_vm0, %v351_v3 }
 0x108   : > { %452 = vmatmul.mubr.f32.gmra.mxu1 %v354_v4  ;;  %440 = vmatmul.mubr.f32.gmra.mxu0 %v350_v5 }
 0x1c4   : > { %v1157_v13 = vpop.f32.mrf.mxu0  ;;  %v1159_v14 = vpop.f32.mrf.mxu1 }
 0x1c5   : > { %v470_v17 = vmul.f32 %v463_v11, %v1157_v13  ;;  %v474_v34 = vmul.f32 %v463_v11, %v1159_v14 }
 0x1c6   : > { %v1161_v15 = vpop.f32.mrf.mxu0  ;;  %v1163_v16 = vpop.f32.mrf.mxu1 }
 0x1c7   : > { %v471_v18 = vmul.f32 %v467_v12, %v1161_v15  ;;  %v475_v19 = vmul.f32 %v467_v12, %v1163_v16  ;;  %v494_v27 = vmul.f32 %v470_v17, %v1157_v13  ;;  %v498_v42 = vmul.f32 %v474_v34, %v1159_v14 }
 0x1c8   : > { %v1168_v20 = vpop.f32.mrf.mxu1  ;;  %v1170_v21 = vpop.f32.mrf.mxu0 }
 0x1c9   : > { %v495_v22 = vmul.f32 %v471_v18, %v1161_v15  ;;  %v478_v23 = vsel %vm297_vm2, %v471_v18, 0.0  ;;  %v472_v28 = vmul.f32 %v463_v11, %v1170_v21  ;;  %v486_v32 = vsel %vm297_vm2, %v475_v19, 0.0 }
 0x1ca   : > { %v1174_v24 = vpop.f32.mrf.mxu1  ;;  %v1176_v25 = vpop.f32.mrf.mxu0  ;;  %v479_v26 = vadd.f32 %v478_v23, %v470_v17  ;;  %v499_v35 = vmul.f32 %v475_v19, %v1163_v16  ;;  %v487_v37 = vadd.f32 %v486_v32, %v474_v34  ;;  %v476_v41 = vmul.f32 %v463_v11, %v1168_v20 }
 0x1cb   : > { %v477_v29 = vmul.f32 %v467_v12, %v1174_v24  ;;  %v473_v30 = vmul.f32 %v467_v12, %v1176_v25  ;;  %v502_v31 = vsel %vm297_vm2, %v495_v22, 0.0  ;;  %v496_v45 = vmul.f32 %v472_v28, %v1170_v21 }
 0x1cc   : > { %480 = vadd.xlane.f32.xlu0 %v479_v26  ;;  %v503_v33 = vadd.f32 %v502_v31, %v494_v27  ;;  %v510_v43 = vsel %vm297_vm2, %v499_v35, 0.0  ;;  %v500_v50 = vmul.f32 %v476_v41, %v1168_v20 }
 0x1cd   : > { %v482_v36 = vsel %vm297_vm2, %v473_v30, 0.0  ;;  %v497_v39 = vmul.f32 %v473_v30, %v1176_v25  ;;  %v490_v40 = vsel %vm297_vm2, %v477_v29, 0.0  ;;  %v501_v46 = vmul.f32 %v477_v29, %v1174_v24 }
 0x1ce   : > { %504 = vadd.xlane.f32.xlu1 %v503_v33  ;;  %v483_v38 = vadd.f32 %v482_v36, %v472_v28  ;;  %v491_v44 = vadd.f32 %v490_v40, %v476_v41  ;;  %v511_v48 = vadd.f32 %v510_v43, %v498_v42 }
 0x1cf   : > { %v506_v47 = vsel %vm297_vm2, %v497_v39, 0.0  ;;  %v514_v51 = vsel %vm297_vm2, %v501_v46, 0.0 }
 0x1d0   : > { %488 = vadd.xlane.f32.xlu0 %v487_v37  ;;  %v507_v49 = vadd.f32 %v506_v47, %v496_v45  ;;  %v515_v52 = vadd.f32 %v514_v51, %v500_v50 }
 0x1d2   : > { %484 = vadd.xlane.f32.xlu1 %v483_v38 }
 0x1d4   : > { %492 = vadd.xlane.f32.xlu0 %v491_v44 }
 0x1d6   : > { %512 = vadd.xlane.f32.xlu1 %v511_v48 }
 0x1d8   : > { %508 = vadd.xlane.f32.xlu0 %v507_v49 }
 0x1dc   : > { %516 = vadd.xlane.f32.xlu0 %v515_v52 }
 0x255   : > { %v481_v53 = vpop.xlane.xlu0 %480 }
 0x256   : > { %v518_v54 = vmul.f32 0.0051020407, %v481_v53 }
 0x257   : > { %v505_v55 = vpop.xlane.xlu1 %504 }
 0x258   : > { %v522_v56 = vmul.f32 0.0051020407, %v505_v55  ;;  %v526_v57 = vmul.f32 %v518_v54, %v518_v54  ;;  %v534_v22 = vsub.f32 %v1157_v13, %v518_v54  ;;  %v535_v23 = vsub.f32 %v1161_v15, %v518_v54 }
 0x259   : > { %v489_v58 = vpop.xlane.xlu0 %488 }
 0x25a   : > { %v530_v59 = vsub.f32 %v522_v56, %v526_v57  ;;  %v520_v62 = vmul.f32 0.0051020407, %v489_v58 }
 0x25b   : > { %v485_v60 = vpop.xlane.xlu1 %484 }
 0x25c   : > { %v542_v61 = vadd.f32 1e-05, %v530_v59  ;;  %v519_v0 = vmul.f32 0.0051020407, %v485_v60  ;;  %v528_v2 = vmul.f32 %v520_v62, %v520_v62  ;;  %v538_v13 = vsub.f32 %v1159_v14, %v520_v62 }
 0x25d   : > { %v493_v63 = vpop.xlane.xlu0 %492  ;;  %v539_v15 = vsub.f32 %v1163_v16, %v520_v62 }
 0x25e   : > { %799 = vrsqrt.f32 %v542_v61  ;;  %v521_v5 = vmul.f32 0.0051020407, %v493_v63  ;;  %v527_v8 = vmul.f32 %v519_v0, %v519_v0  ;;  %v536_v33 = vsub.f32 %v1170_v21, %v519_v0 }
 0x25f   : > { %v513_v1 = vpop.xlane.xlu1 %512  ;;  %v537_v34 = vsub.f32 %v1176_v25, %v519_v0 }
 0x260   : > { %v524_v3 = vmul.f32 0.0051020407, %v513_v1  ;;  %v529_v17 = vmul.f32 %v521_v5, %v521_v5  ;;  %v540_v14 = vsub.f32 %v1168_v20, %v521_v5  ;;  %v541_v16 = vsub.f32 %v1174_v24, %v521_v5 }
 0x261   : > { %v509_v4 = vpop.xlane.xlu0 %508 }
 0x262   : > { %v532_v6 = vsub.f32 %v524_v3, %v528_v2  ;;  %v523_v7 = vmul.f32 0.0051020407, %v509_v4 }
 0x264   : > { %v544_v9 = vadd.f32 1e-05, %v532_v6  ;;  %v531_v10 = vsub.f32 %v523_v7, %v527_v8 }
 0x265   : > { %v517_v11 = vpop.xlane.xlu0 %516 }
 0x266   : > { %801 = vrsqrt.f32 %v544_v9  ;;  %v543_v12 = vadd.f32 1e-05, %v531_v10  ;;  %v525_v18 = vmul.f32 0.0051020407, %v517_v11 }
 0x268   : > { %803 = vrsqrt.f32 %v543_v12  ;;  %v533_v19 = vsub.f32 %v525_v18, %v529_v17 }
 0x26a   : > { %v545_v26 = vadd.f32 1e-05, %v533_v19 }
 0x26b   : > { %v800_v27 = vpop.eup %799 }
 0x26c   : > { %v550_v28 = vmul.f32 %v800_v27, %v534_v22  ;;  %v551_v29 = vmul.f32 %v800_v27, %v535_v23  ;;  %805 = vrsqrt.f32 %v545_v26 }
 0x26e   : > { %v558_v30 = vmax.f32 %v550_v28, 0.0  ;;  %v559_v31 = vmax.f32 %v551_v29, 0.0 }
 0x270   : > { %566 = vst [vmem:[%s1200_s10] sm:$0xff] %v558_v30  ;;  %567 = vst.msk [vmem:[%s1200_s10 + $0x8] sm:$0xff] %vm297_vm2, %v559_v31 }
 0x273   : > { %v802_v32 = vpop.eup %801 }
 0x274   : > { %v554_v35 = vmul.f32 %v802_v32, %v538_v13  ;;  %v555_v36 = vmul.f32 %v802_v32, %v539_v15 }
 0x275   : > { %v804_v37 = vpop.eup %803 }
 0x276   : > { %v562_v38 = vmax.f32 %v554_v35, 0.0  ;;  %v563_v39 = vmax.f32 %v555_v36, 0.0  ;;  %v552_v40 = vmul.f32 %v804_v37, %v536_v33  ;;  %v553_v41 = vmul.f32 %v804_v37, %v537_v34 }
 0x278   : > { %570 = vst [vmem:[%s1200_s10 + $0x20] sm:$0xff] %v562_v38  ;;  %571 = vst.msk [vmem:[%s1200_s10 + $0x28] sm:$0xff] %vm297_vm2, %v563_v39  ;;  %v560_v21 = vmax.f32 %v552_v40, 0.0  ;;  %v561_v25 = vmax.f32 %v553_v41, 0.0 }
 0x279   : > { %v806_v42 = vpop.eup %805 }
 0x27a   : > { %568 = vst [vmem:[%s1200_s10 + $0x10] sm:$0xff] %v560_v21  ;;  %569 = vst.msk [vmem:[%s1200_s10 + $0x18] sm:$0xff] %vm297_vm2, %v561_v25  ;;  %v556_v43 = vmul.f32 %v806_v42, %v540_v14  ;;  %v557_v44 = vmul.f32 %v806_v42, %v541_v16 }
 0x27c   : > { %v564_v20 = vmax.f32 %v556_v43, 0.0  ;;  %v565_v24 = vmax.f32 %v557_v44, 0.0 }
 0x27e   : > { %572 = vst [vmem:[%s1200_s10 + $0x30] sm:$0xff] %v564_v20  ;;  %573 = vst.msk [vmem:[%s1200_s10 + $0x38] sm:$0xff] %vm297_vm2, %v565_v24 }
 0x27f   : > { %874 = shalt.err (!%p871_p0)
}
 0x280   : > { %s875_s23 = scalar_lea.hbm %s1222_s29, 1024  ;;  %s879_s4 = scalar_lea.hbm %s1273_s3, 2048 }
 0x281   : > { %p876_p5 = scmp.ne.s32.totalorder %s1222_s29, %s875_s23  ;;  %p880_p4 = scmp.lt.s32.totalorder %s1222_s29, %s1273_s3 }
 0x282   : > { %p881_p6 = scmp.lt.s32.totalorder %s879_s4, %s875_s23 }
 0x283   : > { %p877_p9 = pnand %p876_p5, %p1289_p11 }
 0x284   : > { %p882_p8 = por %p881_p6, %p880_p4 }
 0x285   : > { %p878_p1 = pneg %p877_p9 }
 0x287   : > { %p883_p3 = pnand %p882_p8, %p878_p1 }
 0x289   : > { %886 = shalt.err (!%p883_p3)
}
 0x28a   : > { %s946_s9 = smov 256   ;;  %s947_s10 = smov 16  }
 0x28b   : > { %734 = dma.vmem_to_hbm [thread:$0]  (%p1289_p11), %s1224_s22, 1024, %s1222_s29, %s575_s16, %s946_s9, %s946_s9, %s947_s10  }
 0x28c PF: > { %s603_s11 = sand.u32 1, %s917_s12   ;;  %p1290_p7 = scmp.ne.s32.totalorder %s1279_s19, 0 }
 0x28d   : > { %p1291_p12 = scmp.ge.s32.totalorder %s929_s15, 2  ;;  %s604_s27 = scalar_lea.sflag [#allocation4], %s603_s11 }
 0x28f   : > { %p745_p10 = pnand %p1291_p12, %p1290_p7 }
 0x291   : > { %p746_p2 = pneg %p745_p10 }
 0x293   : > { %912 = dma.done.wait (%p746_p2), %s604_s27, 1024  }
 0x294   : > { %914 = vsyncadd (%p746_p2), %s604_s27, 4294966272  ;;  %p17_p13 = scmp.ge.s32.totalorder %s1022_s24, 4   ;;  %s1292_s12 = smov %s921_s13 }
 0x295   : > { %s1293_s13 = smov %s925_s14  ;;  %s1294_s14 = smov %s1039_s5 }
 0x296   : > { %s1295_s15 = smov %s1022_s24  ;;  %19 = sbr.rel (!%p17_p13) target bundleno = 6 (0x6), region = 81 }
 0x29b   :  { %609 = vsyncpa [#allocation3], 1 }
 0x29c   :  { %611 = vsyncpa [#allocation3 + $0x1], 1 }
 0x29d   :  { %612 = vsyncpa [#allocation6], 1 }
 0x29e   :  { %613 = vsyncpa [#allocation4], 1 }
 0x29f   :  { %615 = vsyncpa [#allocation4 + $0x1], 1 }

</bundles_post_ra>
